<compile_context>
chip_gen: v6e
topology: v6e:2x2x1
jax: 0.10.0
libtpu: 0.0.40
codegen_flags: <defaults>
</compile_context>

<pallas_src>
import functools

import jax
import jax.numpy as jnp
from jax import lax
from jax.experimental import pallas as pl
from jax.experimental.pallas import tpu as pltpu


def _round_up(n: int, m: int) -> int:
    return ((n + m - 1) // m) * m


def _vmem_capacity_bytes() -> int:
    """Per-core VMEM capacity; conservative 64 MiB (v7x) fallback."""
    try:
        return int(pltpu.get_tpu_info().vmem_capacity_bytes)
    except Exception:
        return 64 * 1024 * 1024


def _const_block_spec(shape):
    """BlockSpec for a grid-invariant (weight/bias) slab: single-buffered."""
    idx = lambda i: (0, 0)
    try:
        return pl.BlockSpec(shape, idx, pipeline_mode=pl.Buffered(1))
    except Exception:  # older jax without pipeline_mode / Buffered
        return pl.BlockSpec(shape, idx)


def _choose_tile_and_budget(B, K_pad, H_pad, T_pad, weight_bytes,
                            in_itemsize, vmem_cap):
    """Pick the batch tile tm and an explicit VMEM budget.

    per_row = double-buffered input tile + double-buffered f32 output tile
              + ~2 live f32 activation slabs inside the body.
    """
    per_row = 2 * K_pad * in_itemsize + 2 * T_pad * 4 + 2 * H_pad * 4
    usable = int(vmem_cap * 0.75) - weight_bytes
    if usable >= 8 * per_row:
        tm_cap = min(1024, (usable // per_row) // 8 * 8)
    else:
        tm_cap = 8  # TODO(synk): weights alone near VMEM capacity -> would need K/N tiling
    n_tiles = max(1, -(-B // tm_cap))
    tm = _round_up(-(-B // n_tiles), 8)   # tiles divide B ~evenly, pad <= 7 rows
    M_pad = tm * n_tiles
    need = weight_bytes + tm * per_row
    budget = max(16 << 20, int(need * 1.25) + (1 << 20))
    budget = min(budget, int(vmem_cap * 0.95))
    return tm, M_pad, budget


# ----------------------------------------------------------------------------
# Fused kernel: theta = (relu-FC stack)(x) @ W_theta + b_theta
# ----------------------------------------------------------------------------
def _nbeats_fused_kernel(*refs, num_fc: int, compute_dtype):
    # refs layout:
    #   [0]               x_ref      (tm, K_pad)       compute_dtype
    #   [1 + 2*i]         w_i        (prev_pad, H_pad)  compute_dtype
    #   [2 + 2*i]         b_i        (1, H_pad)         f32
    #   [1 + 2*num_fc]    w_theta    (H_pad, T_pad)     compute_dtype
    #   [2 + 2*num_fc]    b_theta    (1, T_pad)         f32
    #   [3 + 2*num_fc]    theta_ref  (tm, T_pad)        f32 output
    x_ref = refs[0]
    w_theta_ref = refs[1 + 2 * num_fc]
    b_theta_ref = refs[2 + 2 * num_fc]
    theta_ref = refs[3 + 2 * num_fc]

    h = x_ref[...]
    # Statically-unrolled FC stack: h <- relu(h @ W_i + b_i).
    # Activations stay VMEM/vreg-resident between layers; matmuls run with
    # bf16 operands on the MXU, f32 accumulation, f32 bias+ReLU epilogue.
    for i in range(num_fc):
        w = refs[1 + 2 * i][...]
        b = refs[2 + 2 * i][...]
        y = lax.dot_general(
            h.astype(compute_dtype), w,
            dimension_numbers=(((1,), (0,)), ((), ())),
            preferred_element_type=jnp.float32,
        )
        h = jnp.maximum(y + b, 0.0)

    theta = lax.dot_general(
        h.astype(compute_dtype), w_theta_ref[...],
        dimension_numbers=(((1,), (0,)), ((), ())),
        preferred_element_type=jnp.float32,
    )
    theta_ref[...] = (theta + b_theta_ref[...]).astype(theta_ref.dtype)


def _nbeats_fused_call(x_pad, fc_ws, fc_bs, w_theta, b_theta, *,
                       tm, vmem_limit_bytes, compute_dtype):
    M_pad, K_pad = x_pad.shape
    H_pad = fc_ws[0].shape[1]
    T_pad = w_theta.shape[1]
    num_fc = len(fc_ws)

    in_specs = [pl.BlockSpec((tm, K_pad), lambda i: (i, 0))]
    args = [x_pad]
    for w, b in zip(fc_ws, fc_bs):
        in_specs.append(_const_block_spec(w.shape))
        in_specs.append(_const_block_spec(b.shape))
        args += [w, b]
    in_specs.append(_const_block_spec(w_theta.shape))
    in_specs.append(_const_block_spec(b_theta.shape))
    args += [w_theta, b_theta]

    flops = 2 * M_pad * (
        K_pad * H_pad + (num_fc - 1) * H_pad * H_pad + H_pad * T_pad)
    bytes_accessed = int(
        sum(a.size * a.dtype.itemsize for a in args) + M_pad * T_pad * 4)

    kernel = functools.partial(_nbeats_fused_kernel, num_fc=num_fc,
                               compute_dtype=compute_dtype)
    return pl.pallas_call(
        kernel,
        out_shape=jax.ShapeDtypeStruct((M_pad, T_pad), jnp.float32),
        grid_spec=pltpu.PrefetchScalarGridSpec(
            num_scalar_prefetch=0,
            grid=(M_pad // tm,),
            in_specs=in_specs,
            out_specs=pl.BlockSpec((tm, T_pad), lambda i: (i, 0)),
        ),
        compiler_params=pltpu.CompilerParams(
            dimension_semantics=("parallel",),
            vmem_limit_bytes=vmem_limit_bytes,
        ),
        cost_estimate=pl.CostEstimate(
            flops=flops, transcendentals=0, bytes_accessed=bytes_accessed),
    )(*args)


# ----------------------------------------------------------------------------
# Parameters (mirrors nn.Linear default init shapes)
# ----------------------------------------------------------------------------
def init_nbeats_params(key, input_size, num_layers, hidden_size, output_size,
                       n_ahead):
    theta_dim = input_size + output_size * n_ahead
    layer_dims = [(input_size, hidden_size)]
    layer_dims += [(hidden_size, hidden_size)] * (num_layers - 1)

    keys = jax.random.split(key, 2 * (num_layers + 1))
    fc = []
    for i, (fan_in, fan_out) in enumerate(layer_dims):
        bound = 1.0 / (fan_in ** 0.5)
        W = jax.random.uniform(keys[2 * i], (fan_out, fan_in),
                               minval=-bound, maxval=bound, dtype=jnp.float32)
        b = jax.random.uniform(keys[2 * i + 1], (fan_out,),
                               minval=-bound, maxval=bound, dtype=jnp.float32)
        fc.append({"W": W, "b": b})

    bound = 1.0 / (hidden_size ** 0.5)
    Wt = jax.random.uniform(keys[-2], (theta_dim, hidden_size),
                            minval=-bound, maxval=bound, dtype=jnp.float32)
    bt = jax.random.uniform(keys[-1], (theta_dim,),
                            minval=-bound, maxval=bound, dtype=jnp.float32)
    return {"fc": fc, "theta": {"W": Wt, "b": bt}}


# ----------------------------------------------------------------------------
# One-time parameter preparation (hoisted transpose + pad + dtype cast)
# ----------------------------------------------------------------------------
def prepare_nbeats_params(params, *, input_size, output_size, n_ahead,
                          compute_dtype=jnp.bfloat16):
    hidden = params["fc"][0]["W"].shape[0]
    theta_dim = input_size + output_size * n_ahead
    K_pad = _round_up(input_size, 128)
    H_pad = _round_up(hidden, 128)
    T_pad = _round_up(theta_dim, 128)

    fc_ws, fc_bs = [], []
    prev_pad = K_pad
    for layer in params["fc"]:
        W = layer["W"].astype(jnp.float32).T          # MXU-native [in, out]
        in_dim, out_dim = W.shape
        Wp = jnp.pad(W, ((0, prev_pad - in_dim), (0, H_pad - out_dim)))
        fc_ws.append(Wp.astype(compute_dtype))
        fc_bs.append(jnp.pad(layer["b"].astype(jnp.float32),
                             (0, H_pad - out_dim)).reshape(1, H_pad))
        prev_pad = H_pad

    Wt = params["theta"]["W"].astype(jnp.float32).T   # [hidden, theta_dim]
    Wt_pad = jnp.pad(Wt, ((0, H_pad - Wt.shape[0]),
                          (0, T_pad - Wt.shape[1]))).astype(compute_dtype)
    bt_pad = jnp.pad(params["theta"]["b"].astype(jnp.float32),
                     (0, T_pad - theta_dim)).reshape(1, T_pad)

    weight_bytes = int(
        sum(a.size * a.dtype.itemsize for a in fc_ws)
        + sum(a.size * a.dtype.itemsize for a in fc_bs)
        + Wt_pad.size * Wt_pad.dtype.itemsize
        + bt_pad.size * bt_pad.dtype.itemsize)

    return dict(fc_ws=fc_ws, fc_bs=fc_bs, w_theta=Wt_pad, b_theta=bt_pad,
                input_size=input_size, output_size=output_size,
                n_ahead=n_ahead, theta_dim=theta_dim,
                K_pad=K_pad, H_pad=H_pad, T_pad=T_pad,
                compute_dtype=compute_dtype, weight_bytes=weight_bytes)


# ----------------------------------------------------------------------------
# Forward
# ----------------------------------------------------------------------------
def nbeats_forward(prep, x):
    """x: [B, input_size] -> (backcast [B, input_size],
                              forecast [B, n_ahead, output_size])."""
    B, K = x.shape
    assert K == prep["input_size"], (K, prep["input_size"])
    K_pad, H_pad, T_pad = prep["K_pad"], prep["H_pad"], prep["T_pad"]
    compute_dtype = prep["compute_dtype"]
    in_itemsize = jnp.dtype(compute_dtype).itemsize

    tm, M_pad, vmem_budget = _choose_tile_and_budget(
        B, K_pad, H_pad, T_pad, prep["weight_bytes"], in_itemsize,
        _vmem_capacity_bytes())

    x_pad = jnp.pad(x.astype(compute_dtype),
                    ((0, M_pad - B), (0, K_pad - K)))

    theta_pad = _nbeats_fused_call(
        x_pad, prep["fc_ws"], prep["fc_bs"], prep["w_theta"], prep["b_theta"],
        tm=tm, vmem_limit_bytes=vmem_budget, compute_dtype=compute_dtype)

    theta = theta_pad[:B, :prep["theta_dim"]]
    backcast = theta[:, :prep["input_size"]]
    forecast = theta[:, prep["input_size"]:].reshape(
        B, prep["n_ahead"], prep["output_size"])
    return backcast, forecast


if __name__ == "__main__":
    # Small deterministic example consistent with NBeatsBlock's forward.
    input_size = 16
    num_layers = 3
    hidden_size = 32
    output_size = 4
    n_ahead = 3
    B = 8

    key = jax.random.PRNGKey(0)
    k_params, k_x = jax.random.split(key)
    params = init_nbeats_params(k_params, input_size, num_layers, hidden_size,
                                output_size, n_ahead)
    x = jax.random.normal(k_x, (B, input_size), dtype=jnp.float32)

    # Pure-JAX f32 reference of the PyTorch forward semantics.
    h = x
    for layer in params["fc"]:
        h = jnp.maximum(h @ layer["W"].T + layer["b"], 0.0)
    theta_ref = h @ params["theta"]["W"].T + params["theta"]["b"]
    backcast_ref = theta_ref[:, :input_size]
    forecast_ref = theta_ref[:, input_size:].reshape(B, n_ahead, output_size)

    # --- bf16-MXU path (default, fast) ---------------------------------
    prep_bf16 = prepare_nbeats_params(
        params, input_size=input_size, output_size=output_size,
        n_ahead=n_ahead, compute_dtype=jnp.bfloat16)
    backcast, forecast = nbeats_forward(prep_bf16, x)
    backcast = jax.block_until_ready(backcast)
    forecast = jax.block_until_ready(forecast)

    assert backcast.shape == (B, input_size), backcast.shape
    assert forecast.shape == (B, n_ahead, output_size), forecast.shape
    assert jnp.allclose(backcast, backcast_ref, atol=5e-2, rtol=5e-2)
    assert jnp.allclose(forecast, forecast_ref, atol=5e-2, rtol=5e-2)

    # --- f32 path (bit-tight parity with the reference) -----------------
    prep_f32 = prepare_nbeats_params(
        params, input_size=input_size, output_size=output_size,
        n_ahead=n_ahead, compute_dtype=jnp.float32)
    backcast32, forecast32 = nbeats_forward(prep_f32, x)
    backcast32 = jax.block_until_ready(backcast32)
    forecast32 = jax.block_until_ready(forecast32)

    assert jnp.allclose(backcast32, backcast_ref, atol=1e-5, rtol=1e-5)
    assert jnp.allclose(forecast32, forecast_ref, atol=1e-5, rtol=1e-5)

    print("KERNEL_OK")
</pallas_src>

<mosaic_0001>
module attributes {stable_mosaic.version = 11 : i64} {
  func.func @_nbeats_fused_kernel(%arg0: i32, %arg1: memref<8x128xbf16, #tpu.memory_space<vmem>>, %arg2: memref<128x128xbf16, #tpu.memory_space<vmem>>, %arg3: memref<1x128xf32, #tpu.memory_space<vmem>>, %arg4: memref<128x128xbf16, #tpu.memory_space<vmem>>, %arg5: memref<1x128xf32, #tpu.memory_space<vmem>>, %arg6: memref<128x128xbf16, #tpu.memory_space<vmem>>, %arg7: memref<1x128xf32, #tpu.memory_space<vmem>>, %arg8: memref<128x128xbf16, #tpu.memory_space<vmem>>, %arg9: memref<1x128xf32, #tpu.memory_space<vmem>>, %arg10: memref<8x128xf32, #tpu.memory_space<vmem>>) attributes {dimension_semantics = [#tpu.dimension_semantics<parallel>], iteration_bounds = array<i64: 1>, scalar_prefetch = 0 : i64, scratch_operands = 0 : i64, tpu.core_type = #tpu.core_type<tc>, window_params = [{transform_indices = @transform_0, window_bounds = array<i64: 8, 128>}, {pipeline_mode = #tpu.pipeline_mode<synchronous>, transform_indices = @transform_1, window_bounds = array<i64: 128, 128>}, {pipeline_mode = #tpu.pipeline_mode<synchronous>, transform_indices = @transform_2, window_bounds = array<i64: 1, 128>}, {pipeline_mode = #tpu.pipeline_mode<synchronous>, transform_indices = @transform_3, window_bounds = array<i64: 128, 128>}, {pipeline_mode = #tpu.pipeline_mode<synchronous>, transform_indices = @transform_4, window_bounds = array<i64: 1, 128>}, {pipeline_mode = #tpu.pipeline_mode<synchronous>, transform_indices = @transform_5, window_bounds = array<i64: 128, 128>}, {pipeline_mode = #tpu.pipeline_mode<synchronous>, transform_indices = @transform_6, window_bounds = array<i64: 1, 128>}, {pipeline_mode = #tpu.pipeline_mode<synchronous>, transform_indices = @transform_7, window_bounds = array<i64: 128, 128>}, {pipeline_mode = #tpu.pipeline_mode<synchronous>, transform_indices = @transform_8, window_bounds = array<i64: 1, 128>}, {transform_indices = @transform_9, window_bounds = array<i64: 8, 128>}]} {
    %c0 = arith.constant 0 : index
    %c0_0 = arith.constant 0 : index
    %0 = vector.load %arg1[%c0, %c0_0] : memref<8x128xbf16, #tpu.memory_space<vmem>>, vector<8x128xbf16>
    %c0_1 = arith.constant 0 : index
    %c0_2 = arith.constant 0 : index
    %1 = vector.load %arg2[%c0_1, %c0_2] : memref<128x128xbf16, #tpu.memory_space<vmem>>, vector<128x128xbf16>
    %c0_3 = arith.constant 0 : index
    %c0_4 = arith.constant 0 : index
    %2 = vector.load %arg3[%c0_3, %c0_4] : memref<1x128xf32, #tpu.memory_space<vmem>>, vector<1x128xf32>
    %cst = arith.constant dense<0.000000e+00> : vector<8x128xf32>
    %3 = tpu.matmul %0, %1, %cst {dimension_numbers = #tpu.dot_dimension_numbers<[1], [0], [0], [1], [0, 0, 1, 1], [], []>} : vector<8x128xbf16>, vector<128x128xbf16>, vector<8x128xf32> -> vector<8x128xf32>
    %4 = vector.broadcast %2 : vector<1x128xf32> to vector<8x128xf32>
    %5 = arith.addf %3, %4 : vector<8x128xf32>
    %cst_5 = arith.constant 0.000000e+00 : f32
    %6 = vector.broadcast %cst_5 : f32 to vector<8x128xf32>
    %7 = arith.maximumf %5, %6 : vector<8x128xf32>
    %c0_6 = arith.constant 0 : index
    %c0_7 = arith.constant 0 : index
    %8 = vector.load %arg4[%c0_6, %c0_7] : memref<128x128xbf16, #tpu.memory_space<vmem>>, vector<128x128xbf16>
    %c0_8 = arith.constant 0 : index
    %c0_9 = arith.constant 0 : index
    %9 = vector.load %arg5[%c0_8, %c0_9] : memref<1x128xf32, #tpu.memory_space<vmem>>, vector<1x128xf32>
    %10 = arith.truncf %7 : vector<8x128xf32> to vector<8x128xbf16>
    %cst_10 = arith.constant dense<0.000000e+00> : vector<8x128xf32>
    %11 = tpu.matmul %10, %8, %cst_10 {dimension_numbers = #tpu.dot_dimension_numbers<[1], [0], [0], [1], [0, 0, 1, 1], [], []>} : vector<8x128xbf16>, vector<128x128xbf16>, vector<8x128xf32> -> vector<8x128xf32>
    %12 = vector.broadcast %9 : vector<1x128xf32> to vector<8x128xf32>
    %13 = arith.addf %11, %12 : vector<8x128xf32>
    %cst_11 = arith.constant 0.000000e+00 : f32
    %14 = vector.broadcast %cst_11 : f32 to vector<8x128xf32>
    %15 = arith.maximumf %13, %14 : vector<8x128xf32>
    %c0_12 = arith.constant 0 : index
    %c0_13 = arith.constant 0 : index
    %16 = vector.load %arg6[%c0_12, %c0_13] : memref<128x128xbf16, #tpu.memory_space<vmem>>, vector<128x128xbf16>
    %c0_14 = arith.constant 0 : index
    %c0_15 = arith.constant 0 : index
    %17 = vector.load %arg7[%c0_14, %c0_15] : memref<1x128xf32, #tpu.memory_space<vmem>>, vector<1x128xf32>
    %18 = arith.truncf %15 : vector<8x128xf32> to vector<8x128xbf16>
    %cst_16 = arith.constant dense<0.000000e+00> : vector<8x128xf32>
    %19 = tpu.matmul %18, %16, %cst_16 {dimension_numbers = #tpu.dot_dimension_numbers<[1], [0], [0], [1], [0, 0, 1, 1], [], []>} : vector<8x128xbf16>, vector<128x128xbf16>, vector<8x128xf32> -> vector<8x128xf32>
    %20 = vector.broadcast %17 : vector<1x128xf32> to vector<8x128xf32>
    %21 = arith.addf %19, %20 : vector<8x128xf32>
    %cst_17 = arith.constant 0.000000e+00 : f32
    %22 = vector.broadcast %cst_17 : f32 to vector<8x128xf32>
    %23 = arith.maximumf %21, %22 : vector<8x128xf32>
    %24 = arith.truncf %23 : vector<8x128xf32> to vector<8x128xbf16>
    %c0_18 = arith.constant 0 : index
    %c0_19 = arith.constant 0 : index
    %25 = vector.load %arg8[%c0_18, %c0_19] : memref<128x128xbf16, #tpu.memory_space<vmem>>, vector<128x128xbf16>
    %cst_20 = arith.constant dense<0.000000e+00> : vector<8x128xf32>
    %26 = tpu.matmul %24, %25, %cst_20 {dimension_numbers = #tpu.dot_dimension_numbers<[1], [0], [0], [1], [0, 0, 1, 1], [], []>} : vector<8x128xbf16>, vector<128x128xbf16>, vector<8x128xf32> -> vector<8x128xf32>
    %c0_21 = arith.constant 0 : index
    %c0_22 = arith.constant 0 : index
    %27 = vector.load %arg9[%c0_21, %c0_22] : memref<1x128xf32, #tpu.memory_space<vmem>>, vector<1x128xf32>
    %28 = vector.broadcast %27 : vector<1x128xf32> to vector<8x128xf32>
    %29 = arith.addf %26, %28 : vector<8x128xf32>
    %c0_23 = arith.constant 0 : index
    %c0_24 = arith.constant 0 : index
    %30 = vector.load %arg10[%c0_23, %c0_24] : memref<8x128xf32, #tpu.memory_space<vmem>>, vector<8x128xf32>
    tpu.vector_store %arg10[%c0_23, %c0_24], %29 {strides = array<i32>} : memref<8x128xf32, #tpu.memory_space<vmem>>, vector<8x128xf32>,
    return
  }
  func.func @transform_0(%arg0: i32) -> (i32, i32) {
    %c0_i32 = arith.constant 0 : i32
    %c0_i32_0 = arith.constant 0 : i32
    return %arg0, %c0_i32 : i32, i32
  }
  func.func @transform_1(%arg0: i32) -> (i32, i32) {
    %c0_i32 = arith.constant 0 : i32
    %c0_i32_0 = arith.constant 0 : i32
    %c0_i32_1 = arith.constant 0 : i32
    return %c0_i32, %c0_i32_0 : i32, i32
  }
  func.func @transform_2(%arg0: i32) -> (i32, i32) {
    %c0_i32 = arith.constant 0 : i32
    %c0_i32_0 = arith.constant 0 : i32
    %c0_i32_1 = arith.constant 0 : i32
    return %c0_i32, %c0_i32_0 : i32, i32
  }
  func.func @transform_3(%arg0: i32) -> (i32, i32) {
    %c0_i32 = arith.constant 0 : i32
    %c0_i32_0 = arith.constant 0 : i32
    %c0_i32_1 = arith.constant 0 : i32
    return %c0_i32, %c0_i32_0 : i32, i32
  }
  func.func @transform_4(%arg0: i32) -> (i32, i32) {
    %c0_i32 = arith.constant 0 : i32
    %c0_i32_0 = arith.constant 0 : i32
    %c0_i32_1 = arith.constant 0 : i32
    return %c0_i32, %c0_i32_0 : i32, i32
  }
  func.func @transform_5(%arg0: i32) -> (i32, i32) {
    %c0_i32 = arith.constant 0 : i32
    %c0_i32_0 = arith.constant 0 : i32
    %c0_i32_1 = arith.constant 0 : i32
    return %c0_i32, %c0_i32_0 : i32, i32
  }
  func.func @transform_6(%arg0: i32) -> (i32, i32) {
    %c0_i32 = arith.constant 0 : i32
    %c0_i32_0 = arith.constant 0 : i32
    %c0_i32_1 = arith.constant 0 : i32
    return %c0_i32, %c0_i32_0 : i32, i32
  }
  func.func @transform_7(%arg0: i32) -> (i32, i32) {
    %c0_i32 = arith.constant 0 : i32
    %c0_i32_0 = arith.constant 0 : i32
    %c0_i32_1 = arith.constant 0 : i32
    return %c0_i32, %c0_i32_0 : i32, i32
  }
  func.func @transform_8(%arg0: i32) -> (i32, i32) {
    %c0_i32 = arith.constant 0 : i32
    %c0_i32_0 = arith.constant 0 : i32
    %c0_i32_1 = arith.constant 0 : i32
    return %c0_i32, %c0_i32_0 : i32, i32
  }
  func.func @transform_9(%arg0: i32) -> (i32, i32) {
    %c0_i32 = arith.constant 0 : i32
    %c0_i32_0 = arith.constant 0 : i32
    return %arg0, %c0_i32 : i32, i32
  }
}

</mosaic_0001>

<bundles_post_ra>
// kernel: tpu_custom_call.1
= control target key start
LH: loop header
LB: loop body
LE: loop exit
PB: predicated region body
PF: predicated region fallthrough
CT: control target
= control target key end

     0   :  { %14 = vsyncpa [#allocation3], 0  ;;  %s1033_s0 = inlined_call_operand.hbm [shape: bf16[8,128], index: 0, kind: input, shape index: {}]   ;;  %s1034_s1 = inlined_call_operand.hbm [shape: bf16[128,128], index: 1, kind: input, shape index: {}]   ;;  %s1035_s2 = inlined_call_operand.vmem [shape: f32[1,128], index: 2, kind: input, shape index: {}]   ;;  %s1036_s3 = inlined_call_operand.hbm [shape: bf16[128,128], index: 3, kind: input, shape index: {}]   ;;  %s1037_s4 = inlined_call_operand.vmem [shape: f32[1,128], index: 4, kind: input, shape index: {}]   ;;  %s1038_s5 = inlined_call_operand.hbm [shape: bf16[128,128], index: 5, kind: input, shape index: {}]   ;;  %s1039_s6 = inlined_call_operand.vmem [shape: f32[1,128], index: 6, kind: input, shape index: {}]   ;;  %s1040_s7 = inlined_call_operand.hbm [shape: bf16[128,128], index: 7, kind: input, shape index: {}]   ;;  %s1041_s8 = inlined_call_operand.vmem [shape: f32[1,128], index: 8, kind: input, shape index: {}]   ;;  %s1042_s9 = inlined_call_operand.hbm [shape: f32[8,128], index: 9, kind: output, shape index: {}]  }
   0x1   :  { %15 = vsyncpa [#allocation6], 0 }
   0x2   :  { %16 = vsyncpa [#allocation9], 0 }
   0x3   :  { %17 = vsyncpa [#allocation4], 0  ;;  %s891_s30 = smov [#allocation5]  }
   0x4   :  { %s33_s10 = sshll.u32 %s891_s30, 4  ;;  %s34_s10 = int_to_ptr.vmem [resolvable:$true] %s33_s10 }
   0x5   :  { %s771_s11 = scalar_lea.vmem %s34_s10, 1024  ;;  %p776_p1 = scmp.lt.s32.totalorder %s34_s10, %s34_s10 }
   0x6   :  { %p772_p0 = scmp.ne.s32.totalorder %s34_s10, %s771_s11  ;;  %p777_p2 = scmp.lt.s32.totalorder %s771_s11, %s771_s11 }
   0x8   :  { %p778_p3 = por %p777_p2, %p776_p1 }
   0xa   :  { %p779_p4 = pnand %p778_p3, %p772_p0 }
   0xc   :  { %782 = shalt.err (!%p779_p4)
}
   0xd   :  { %s892_s12 = smov 64   ;;  %s893_s13 = smov 4  }
   0xe   :  { %39 = dma.hbm_to_vmem [thread:$0]  %s1034_s1, 1024, %s34_s10, [#allocation6], %s892_s12, %s892_s12, %s893_s13  }
   0xf   :  { %s894_s16 = smov [#allocation8]   ;;  %s895_s18 = smov [#allocation2]  }
  0x10   :  { %s61_s17 = sshll.u32 %s894_s16, 4  ;;  %s24_s19 = sshll.u32 %s895_s18, 4  ;;  %s62_s17 = int_to_ptr.vmem [resolvable:$true] %s61_s17  ;;  %s25_s19 = int_to_ptr.vmem [resolvable:$true] %s24_s19 }
  0x11   :  { %s791_s20 = scalar_lea.vmem %s62_s17, 1024  ;;  %p796_p6 = scmp.lt.s32.totalorder %s62_s17, %s62_s17 }
  0x12   :  { %p792_p5 = scmp.ne.s32.totalorder %s62_s17, %s791_s20  ;;  %p797_p7 = scmp.lt.s32.totalorder %s791_s20, %s791_s20 }
  0x14   :  { %p798_p8 = por %p797_p7, %p796_p6 }
  0x16   :  { %p799_p9 = pnand %p798_p8, %p792_p5 }
  0x18   :  { %802 = shalt.err (!%p799_p9)
}
  0x19   :  { %67 = dma.hbm_to_vmem [thread:$0]  %s1038_s5, 1024, %s62_s17, [#allocation9], %s892_s12, %s892_s12, %s893_s13  }
  0x1a   :  { %s811_s1 = scalar_lea.vmem %s25_s19, 64  ;;  %p816_p11 = scmp.lt.s32.totalorder %s25_s19, %s25_s19 }
  0x1b   :  { %p812_p10 = scmp.ne.s32.totalorder %s25_s19, %s811_s1  ;;  %p817_p12 = scmp.lt.s32.totalorder %s811_s1, %s811_s1 }
  0x1d   :  { %p818_p13 = por %p817_p12, %p816_p11 }
  0x1f   :  { %p819_p0 = pnand %p818_p13, %p812_p10 }
  0x21   :  { %822 = shalt.err (!%p819_p0)
}
  0x22   :  { %27 = dma.hbm_to_vmem [thread:$0]  %s1033_s0, 64, %s25_s19, [#allocation3]  }
  0x23   :  { %s896_s25 = smov [#allocation7]   ;;  %s897_s27 = smov [#allocation10]  }
  0x24   :  { %s47_s26 = sshll.u32 %s896_s25, 4  ;;  %s75_s28 = sshll.u32 %s897_s27, 4  ;;  %s48_s26 = int_to_ptr.vmem [resolvable:$true] %s47_s26  ;;  %s76_s28 = int_to_ptr.vmem [resolvable:$true] %s75_s28 }
  0x25   :  { %s831_s29 = scalar_lea.vmem %s48_s26, 1024  ;;  %p836_p2 = scmp.lt.s32.totalorder %s48_s26, %s48_s26 }
  0x26   :  { %p832_p1 = scmp.ne.s32.totalorder %s48_s26, %s831_s29  ;;  %p837_p3 = scmp.lt.s32.totalorder %s831_s29, %s831_s29 }
  0x28   :  { %p838_p4 = por %p837_p3, %p836_p2 }
  0x2a   :  { %p839_p5 = pnand %p838_p4, %p832_p1 }
  0x2c   :  { %842 = shalt.err (!%p839_p5)
}
  0x2d   :  { %53 = dma.hbm_to_vmem [thread:$0]  %s1036_s3, 1024, %s48_s26, [#allocation6], %s892_s12, %s892_s12, %s893_s13  }
  0x2e   :  { %s851_s0 = scalar_lea.vmem %s76_s28, 1024  ;;  %p856_p7 = scmp.lt.s32.totalorder %s76_s28, %s76_s28 }
  0x2f   :  { %p852_p6 = scmp.ne.s32.totalorder %s76_s28, %s851_s0  ;;  %p857_p8 = scmp.lt.s32.totalorder %s851_s0, %s851_s0 }
  0x31   :  { %p858_p9 = por %p857_p8, %p856_p7 }
  0x33   :  { %p859_p10 = pnand %p858_p9, %p852_p6 }
  0x35   :  { %862 = shalt.err (!%p859_p10)
}
  0x36   :  { %81 = dma.hbm_to_vmem [thread:$0]  %s1040_s7, 1024, %s76_s28, [#allocation9], %s892_s12, %s892_s12, %s893_s13  }
  0x37   :  { %883 = dma.done.wait [#allocation3], 64  }
  0x38   :  { %884 = vsyncadd [#allocation3], 4294967232 }
  0x39   :  { %885 = dma.done.wait [#allocation6], 2048  }
  0x3a   :  { %886 = vsyncadd [#allocation6], 4294965248 }
  0x3b   :  { %887 = dma.done.wait [#allocation9], 2048  }
  0x3c   :  { %888 = vsyncadd [#allocation9], 4294965248  ;;  %v898_v0 = vmov 0.0   ;;  %vm899_vm0 = vmmov 0   ;;  %v731_v1 = vld [vmem:[#allocation5 + $0x38] sm:$0xff]   ;;  %v732_v2 = vld [vmem:[#allocation5 + $0x30] sm:$0xff]  }
  0x3d   :  { %641 = vmatprep.subr.bf16.mxu0 %v898_v0  ;;  %657 = vmatprep.mubr.msk.bf16.mxu0 %vm899_vm0, %v898_v0  ;;  %v733_v3 = vld [vmem:[#allocation5 + $0x28] sm:$0xff]   ;;  %v739_v4 = vld [vmem:[#allocation7 + $0x38] sm:$0xff]   ;;  %v734_v5 = vld [vmem:[#allocation5 + $0x20] sm:$0xff]   ;;  %s900_s16 = smov [#allocation11]  }
  0x3e   :  { %661 = vmatprep.subr.bf16.mxu1 %v898_v0  ;;  %677 = vmatprep.mubr.msk.bf16.mxu1 %vm899_vm0, %v898_v0  ;;  %v740_v6 = vld [vmem:[#allocation7 + $0x30] sm:$0xff]   ;;  %v735_v7 = vld [vmem:[#allocation5 + $0x18] sm:$0xff]   ;;  %v741_v8 = vld [vmem:[#allocation7 + $0x28] sm:$0xff]   ;;  %s558_s17 = sshll.u32 %s900_s16, 4  ;;  %s559_s17 = int_to_ptr.vmem [resolvable:$true] %s558_s17 }
  0x3f   :  { %642 = vmatpush3.bf16.msra.mxu0 %v731_v1  ;;  %662 = vmatpush3.bf16.msra.mxu1 %v739_v4  ;;  %v736_v9 = vld [vmem:[#allocation5 + $0x10] sm:$0xff]   ;;  %v742_v10 = vld [vmem:[#allocation7 + $0x20] sm:$0xff]   ;;  %v737_v11 = vld [vmem:[#allocation5 + $0x8] sm:$0xff]   ;;  %p868_p12 = scmp.lt.s32.totalorder %s559_s17, %s559_s17 }
  0x40   :  { %643 = vmatprep.subr.bf16.mxu0 %v898_v0  ;;  %663 = vmatprep.subr.bf16.mxu1 %v898_v0  ;;  %v743_v12 = vld [vmem:[#allocation7 + $0x18] sm:$0xff]   ;;  %v738_v13 = vld [vmem:[#allocation5] sm:$0xff]   ;;  %v744_v14 = vld [vmem:[#allocation7 + $0x10] sm:$0xff]  }
  0x41   :  { %v100_v15 = vld [vmem:[#allocation2] sm:$0xf]  ;;  %v745_v16 = vld [vmem:[#allocation7 + $0x8] sm:$0xff]   ;;  %v746_v17 = vld [vmem:[#allocation7] sm:$0xff]  }
  0x42   :  { %v747_v18 = vld [vmem:[#allocation8 + $0x38] sm:$0xff]   ;;  %v748_v19 = vld [vmem:[#allocation8 + $0x30] sm:$0xff]   ;;  %v749_v20 = vld [vmem:[#allocation8 + $0x28] sm:$0xff]  }
  0x43   :  { %644 = vmatpush3.bf16.msra.mxu0 %v732_v2  ;;  %664 = vmatpush3.bf16.msra.mxu1 %v740_v6  ;;  %v750_v21 = vld [vmem:[#allocation8 + $0x20] sm:$0xff]   ;;  %v751_v22 = vld [vmem:[#allocation8 + $0x18] sm:$0xff]   ;;  %v752_v23 = vld [vmem:[#allocation8 + $0x10] sm:$0xff]  }
  0x44   :  { %645 = vmatprep.subr.bf16.mxu0 %v898_v0  ;;  %665 = vmatprep.subr.bf16.mxu1 %v898_v0  ;;  %v569_v24 = vld [vmem:[%s1035_s2] ss:$0 sm:$0xff]  ;;  %v753_v32 = vld [vmem:[#allocation8 + $0x8] sm:$0xff]   ;;  %v754_v33 = vld [vmem:[#allocation8] sm:$0xff]  }
  0x45   :  { %v755_v34 = vld [vmem:[#allocation10 + $0x38] sm:$0xff]   ;;  %v756_v35 = vld [vmem:[#allocation10 + $0x30] sm:$0xff]   ;;  %v757_v36 = vld [vmem:[#allocation10 + $0x28] sm:$0xff]  }
  0x46   :  { %v758_v37 = vld [vmem:[#allocation10 + $0x20] sm:$0xff]   ;;  %v759_v38 = vld [vmem:[#allocation10 + $0x18] sm:$0xff]   ;;  %v760_v39 = vld [vmem:[#allocation10 + $0x10] sm:$0xff]  }
  0x47   :  { %646 = vmatpush3.bf16.msra.mxu0 %v733_v3  ;;  %666 = vmatpush3.bf16.msra.mxu1 %v741_v8  ;;  %v578_v40 = vld [vmem:[%s1037_s4] ss:$0 sm:$0xff]  ;;  %v761_v48 = vld [vmem:[#allocation10 + $0x8] sm:$0xff]   ;;  %v762_v49 = vld [vmem:[#allocation10] sm:$0xff]  }
  0x48   :  { %647 = vmatprep.subr.bf16.mxu0 %v898_v0  ;;  %667 = vmatprep.subr.bf16.mxu1 %v898_v0  ;;  %v587_v50 = vld [vmem:[%s1039_s6] ss:$0 sm:$0xff]  ;;  %s863_s6 = scalar_lea.vmem %s559_s17, 128 }
  0x49   :  { %v596_v58 = vld [vmem:[%s1041_s8] ss:$0 sm:$0xff]  ;;  %p864_p11 = scmp.ne.s32.totalorder %s559_s17, %s863_s6  ;;  %p869_p13 = scmp.lt.s32.totalorder %s863_s6, %s863_s6 }
  0x4b   :  { %648 = vmatpush3.bf16.msra.mxu0 %v734_v5  ;;  %668 = vmatpush3.bf16.msra.mxu1 %v742_v10  ;;  %p870_p0 = por %p869_p13, %p868_p12 }
  0x4c   :  { %649 = vmatprep.subr.bf16.mxu0 %v898_v0  ;;  %669 = vmatprep.subr.bf16.mxu1 %v898_v0 }
  0x4d   :  { %p871_p1 = pnand %p870_p0, %p864_p11 }
  0x4f   :  { %650 = vmatpush3.bf16.msra.mxu0 %v735_v7  ;;  %670 = vmatpush3.bf16.msra.mxu1 %v743_v12 }
  0x50   :  { %651 = vmatprep.subr.bf16.mxu0 %v898_v0  ;;  %671 = vmatprep.subr.bf16.mxu1 %v898_v0 }
  0x53   :  { %652 = vmatpush3.bf16.msra.mxu0 %v736_v9  ;;  %672 = vmatpush3.bf16.msra.mxu1 %v744_v14 }
  0x54   :  { %653 = vmatprep.subr.bf16.mxu0 %v898_v0  ;;  %673 = vmatprep.subr.bf16.mxu1 %v898_v0 }
  0x57   :  { %654 = vmatpush3.bf16.msra.mxu0 %v737_v11  ;;  %674 = vmatpush3.bf16.msra.mxu1 %v745_v16 }
  0x58   :  { %655 = vmatprep.subr.bf16.mxu0 %v898_v0  ;;  %675 = vmatprep.subr.bf16.mxu1 %v898_v0 }
  0x5b   :  { %656 = vmatpush3.bf16.msra.mxu0 %v738_v13  ;;  %676 = vmatpush3.bf16.msra.mxu1 %v746_v17 }
  0x5c   :  { %681 = vmatprep.subr.bf16.mxu0 %v898_v0  ;;  %701 = vmatprep.subr.bf16.mxu1 %v898_v0 }
  0x5e   :  { %658 = vmatmul.mubr.bf16.vlgmr.msra.gmra.mxu0 %v100_v15 }
  0x5f   :  { %697 = vmatprep.mubr.msk.bf16.mxu0 %vm899_vm0, %v898_v0  ;;  %682 = vmatpush3.bf16.msra.mxu0 %v747_v18 }
  0x60   :  { %683 = vmatprep.subr.bf16.mxu0 %v898_v0 }
  0x63   :  { %684 = vmatpush3.bf16.msra.mxu0 %v748_v19 }
  0x64   :  { %685 = vmatprep.subr.bf16.mxu0 %v898_v0 }
  0x67   :  { %686 = vmatpush3.bf16.msra.mxu0 %v749_v20 }
  0x68   :  { %687 = vmatprep.subr.bf16.mxu0 %v898_v0 }
  0x6b   :  { %688 = vmatpush3.bf16.msra.mxu0 %v750_v21 }
  0x6c   :  { %689 = vmatprep.subr.bf16.mxu0 %v898_v0 }
  0x6f   :  { %690 = vmatpush3.bf16.msra.mxu0 %v751_v22 }
  0x70   :  { %691 = vmatprep.subr.bf16.mxu0 %v898_v0 }
  0x73   :  { %692 = vmatpush3.bf16.msra.mxu0 %v752_v23 }
  0x74   :  { %693 = vmatprep.subr.bf16.mxu0 %v898_v0 }
  0x77   :  { %694 = vmatpush3.bf16.msra.mxu0 %v753_v32 }
  0x78   :  { %695 = vmatprep.subr.bf16.mxu0 %v898_v0 }
  0x7b   :  { %696 = vmatpush3.bf16.msra.mxu0 %v754_v33 }
 0x11e   :  { %v206_v25 = vpop.f32.mrf.mxu0 }
 0x11f   :  { %v207_v26 = vadd.f32 %v569_v24, %v206_v25 }
 0x120   :  { %v659_v27 = vpop.f32.mrf.mxu0 }
 0x121   :  { %v212_v28 = vmax.f32 %v207_v26, 0.0 }
 0x122   :  { %v209_v29 = vpop.f32.mrf.mxu0 }
 0x123   :  { %v230_v30 = vpack.c.bf16 %v212_v28, %v212_v28 }
 0x124   :  { %v660_v31 = vpop.f32.mrf.mxu0 }
 0x125   :  { %678 = vmatmul.mubr.bf16.vlgmr.msra.gmra.mxu1 %v230_v30 }
 0x126   :  { %717 = vmatprep.mubr.msk.bf16.mxu1 %vm899_vm0, %v898_v0  ;;  %702 = vmatpush3.bf16.msra.mxu1 %v755_v34 }
 0x127   :  { %703 = vmatprep.subr.bf16.mxu1 %v898_v0 }
 0x12a   :  { %704 = vmatpush3.bf16.msra.mxu1 %v756_v35 }
 0x12b   :  { %705 = vmatprep.subr.bf16.mxu1 %v898_v0 }
 0x12e   :  { %706 = vmatpush3.bf16.msra.mxu1 %v757_v36 }
 0x12f   :  { %707 = vmatprep.subr.bf16.mxu1 %v898_v0 }
 0x132   :  { %708 = vmatpush3.bf16.msra.mxu1 %v758_v37 }
 0x133   :  { %709 = vmatprep.subr.bf16.mxu1 %v898_v0 }
 0x136   :  { %710 = vmatpush3.bf16.msra.mxu1 %v759_v38 }
 0x137   :  { %711 = vmatprep.subr.bf16.mxu1 %v898_v0 }
 0x13a   :  { %712 = vmatpush3.bf16.msra.mxu1 %v760_v39 }
 0x13b   :  { %713 = vmatprep.subr.bf16.mxu1 %v898_v0 }
 0x13e   :  { %714 = vmatpush3.bf16.msra.mxu1 %v761_v48 }
 0x13f   :  { %715 = vmatprep.subr.bf16.mxu1 %v898_v0 }
 0x142   :  { %716 = vmatpush3.bf16.msra.mxu1 %v762_v49 }
 0x1e5   :  { %v319_v41 = vpop.f32.mrf.mxu1 }
 0x1e6   :  { %v320_v42 = vadd.f32 %v578_v40, %v319_v41 }
 0x1e7   :  { %v679_v43 = vpop.f32.mrf.mxu1 }
 0x1e8   :  { %v325_v44 = vmax.f32 %v320_v42, 0.0 }
 0x1e9   :  { %v322_v45 = vpop.f32.mrf.mxu1 }
 0x1ea   :  { %v343_v46 = vpack.c.bf16 %v325_v44, %v325_v44 }
 0x1eb   :  { %v680_v47 = vpop.f32.mrf.mxu1 }
 0x1ec   :  { %698 = vmatmul.mubr.bf16.vlgmr.msra.gmra.mxu0 %v343_v46 }
 0x2ac   :  { %v432_v51 = vpop.f32.mrf.mxu0 }
 0x2ad   :  { %v433_v52 = vadd.f32 %v587_v50, %v432_v51 }
 0x2ae   :  { %v699_v53 = vpop.f32.mrf.mxu0 }
 0x2af   :  { %v438_v54 = vmax.f32 %v433_v52, 0.0 }
 0x2b0   :  { %v435_v55 = vpop.f32.mrf.mxu0 }
 0x2b1   :  { %v439_v56 = vpack.c.bf16 %v438_v54, %v438_v54 }
 0x2b2   :  { %v700_v57 = vpop.f32.mrf.mxu0 }
 0x2b3   :  { %718 = vmatmul.mubr.bf16.vlgmr.msra.gmra.mxu1 %v439_v56 }
 0x373   :  { %v545_v59 = vpop.f32.mrf.mxu1 }
 0x374   :  { %v546_v60 = vadd.f32 %v596_v58, %v545_v59 }
 0x375   :  { %v719_v61 = vpop.f32.mrf.mxu1 }
 0x376   :  { %551 = vst [vmem:[#allocation11] sm:$0xff] %v546_v60 }
 0x377   :  { %v548_v62 = vpop.f32.mrf.mxu1 }
 0x378   :  { %874 = shalt.err (!%p871_p1)
}
 0x379   :  { %561 = dma.vmem_to_hbm [thread:$0]  %s559_s17, 128, %s1042_s9, [#allocation4]   ;;  %v720_v63 = vpop.f32.mrf.mxu1 }
 0x37a   :  { %889 = dma.done.wait [#allocation4], 128  }
 0x37b   :  { %890 = vsyncadd [#allocation4], 4294967168 }
 0x37c   :  { %565 = vsyncpa [#allocation3], 1 }
 0x37d   :  { %566 = vsyncpa [#allocation6], 1 }
 0x37e   :  { %567 = vsyncpa [#allocation9], 1 }
 0x37f   :  { %568 = vsyncpa [#allocation4], 1 }

</bundles_post_ra>
